<compile_context>
chip_gen: v5e
topology: v5e:2x2
jax: 0.10.0
libtpu: 0.0.40
codegen_flags: <defaults>
</compile_context>

<pallas_src>
import numpy as np
import jax
import jax.numpy as jnp
from jax.experimental import pallas as pl
from jax.experimental.pallas import tpu as pltpu


_VMEM_LIMIT_BYTES = 32 * 1024 * 1024      # > v5e's 16 MiB scoped default, <= v7x physical
_TILE_BUDGET = 2 * 1024 * 1024            # per streamed x/out tile (each double-buffered)
_PE_RESIDENT_BUDGET = 6 * 1024 * 1024     # resident pe slab per d-block (incl. sublane pad)


def make_pe_table(d_model: int, max_len: int = 80) -> jnp.ndarray:
    """Deterministic positional-encoding buffer, shape (max_len, 1, d_model)."""
    position = np.arange(max_len, dtype=np.float32)[:, None]               # (max_len, 1)
    div_term = np.exp(np.arange(0, d_model, 2, dtype=np.float32)
                      * (-np.log(10000.0) / d_model))                      # (ceil(d/2),)
    pe = np.zeros((max_len, d_model), dtype=np.float32)
    pe[:, 0::2] = np.sin(position * div_term)
    pe[:, 1::2] = np.cos(position * div_term)[:, : d_model // 2]
    return jnp.asarray(pe[:, None, :])                                     # (max_len, 1, d_model)


def _round_up(x: int, m: int) -> int:
    return -(-x // m) * m


def _round_down(x: int, m: int) -> int:
    return (x // m) * m


def _add_kernel(x_ref, pe_ref, o_ref):
    # Works for both the folded 2-D path (equal-shape tiles) and the 3-D
    # streamed-pe fallback ((ts, batch, td) + (ts, 1, td) broadcast).
    o_ref[...] = (x_ref[...] + pe_ref[...]).astype(o_ref.dtype)


def _add_pe_resident_kernel(x_ref, pe_ref, o_ref):
    # x_ref/o_ref: (ts, batch, td) tile.  pe_ref: (seq_pad, 1, td) d-slab,
    # resident in VMEM (constant seq block index -> DMA'd once per d-block),
    # sliced per seq tile and broadcast over batch.
    ts = x_ref.shape[0]
    start = pl.multiple_of(pl.program_id(1) * ts, ts)
    pe_blk = pe_ref[pl.ds(start, ts)]                      # (ts, 1, td)
    o_ref[...] = (x_ref[...] + pe_blk).astype(o_ref.dtype)


def positional_encoding(x: jnp.ndarray, pe: jnp.ndarray) -> jnp.ndarray:
    """x: (seq, batch, d_model); pe: (max_len, 1, d_model). Returns x + pe[:seq]."""
    seq, batch, d_model = x.shape
    if seq > pe.shape[0]:
        raise ValueError("seq_len exceeds max_len of the positional-encoding table")

    pe_sliced = pe[:seq].astype(x.dtype)                   # (seq, 1, d_model)
    itemsize = x.dtype.itemsize
    pack = max(8, 32 // itemsize)                          # sublane packing: f32 8, bf16 16
    compiler_params = pltpu.CompilerParams(
        dimension_semantics=("parallel", "parallel"),
        vmem_limit_bytes=_VMEM_LIMIT_BYTES)

    if d_model % 128 == 0 and batch >= pack:
        # ---- Path A: 3-D tiles, pe resident per d-block -------------------
        batch_pad = _round_up(batch, pack)                 # sublane padding of batch in VMEM
        # Lane tile over d_model so a single (1, batch, td) row fits the budget.
        td = min(d_model,
                 max(128, _round_down(_TILE_BUDGET // (batch_pad * itemsize), 128)))
        nb_d = pl.cdiv(d_model, td)
        row_bytes = batch_pad * td * itemsize
        ts = max(1, min(seq, _TILE_BUDGET // row_bytes))
        nb_s = pl.cdiv(seq, ts)
        if nb_d * nb_s == 1 and seq >= 2:                  # >= 2 steps so megacore can split
            ts = -(-seq // 2)
            nb_s = pl.cdiv(seq, ts)
        seq_pad = nb_s * ts

        pe_resident_bytes = seq_pad * pack * td * itemsize
        if pe_resident_bytes <= _PE_RESIDENT_BUDGET:
            # Common case (max_len ~ 80): keep the whole pe d-slab in VMEM.
            pe_arr = jnp.pad(pe_sliced, ((0, seq_pad - seq), (0, 0), (0, 0)))
            kernel = _add_pe_resident_kernel
            pe_spec = pl.BlockSpec((seq_pad, 1, td), lambda d, s: (0, 0, d))
        else:
            # Huge custom table: stream a small pe block per seq tile instead.
            pe_arr = pe_sliced
            kernel = _add_kernel
            pe_spec = pl.BlockSpec((ts, 1, td), lambda d, s: (s, 0, d))

        return pl.pallas_call(
            kernel,
            out_shape=jax.ShapeDtypeStruct((seq, batch, d_model), x.dtype),
            grid_spec=pltpu.PrefetchScalarGridSpec(
                num_scalar_prefetch=0,
                grid=(nb_d, nb_s),                         # seq innermost -> pe block cached
                in_specs=[
                    pl.BlockSpec((ts, batch, td), lambda d, s: (s, 0, d)),
                    pe_spec,
                ],
                out_specs=pl.BlockSpec((ts, batch, td), lambda d, s: (s, 0, d)),
            ),
            compiler_params=compiler_params,
            input_output_aliases={0: 0},
        )(x, pe_arr)

    # ---- Path B: fold batch into the lane dimension -----------------------
    # Lane width f = batch*d_model -> full-width stores; pe pre-broadcast over
    # batch (small here since this path is taken for small batch / small d).
    f = batch * d_model
    x2 = x.reshape(seq, f)                                 # free (row-major contiguous)
    pe2 = jnp.tile(pe_sliced[:, 0, :], (1, batch))         # (seq, f), matches x2 layout

    if 8 * f * itemsize <= _TILE_BUDGET or f <= 128:
        tf = f                                             # full lane extent
    else:
        tf = max(128, _round_down(_TILE_BUDGET // (8 * itemsize), 128))
        tf = min(tf, _round_down(f, 128))
    nb_f = pl.cdiv(f, tf)

    ts = max(1, min(seq, _TILE_BUDGET // max(1, tf * itemsize)))
    if ts < seq:
        ts = max(8, _round_down(ts, 8))                    # sublane-aligned 2-D block
    nb_s = pl.cdiv(seq, ts)
    if nb_s * nb_f == 1 and seq >= 16:                     # >= 2 steps for megacore
        ts = max(8, _round_up(-(-seq // 2), 8))
        nb_s = pl.cdiv(seq, ts)

    out2 = pl.pallas_call(
        _add_kernel,
        out_shape=jax.ShapeDtypeStruct((seq, f), x.dtype),
        grid_spec=pltpu.PrefetchScalarGridSpec(
            num_scalar_prefetch=0,
            grid=(nb_s, nb_f),
            in_specs=[
                pl.BlockSpec((ts, tf), lambda s, j: (s, j)),
                pl.BlockSpec((ts, tf), lambda s, j: (s, j)),
            ],
            out_specs=pl.BlockSpec((ts, tf), lambda s, j: (s, j)),
        ),
        compiler_params=compiler_params,
        input_output_aliases={0: 0},
    )(x2, pe2)
    return out2.reshape(seq, batch, d_model)


if __name__ == "__main__":
    max_len = 80
    fwd = jax.jit(positional_encoding)

    # Case 1: d_model < 128 -> folded lane path (masked lanes, tiny).
    seq, batch, d_model = 8, 2, 32
    pe = make_pe_table(d_model, max_len)
    x = jax.random.normal(jax.random.PRNGKey(0), (seq, batch, d_model), dtype=jnp.float32)
    ref = x + pe[:seq]
    out = jax.block_until_ready(fwd(x, pe))
    np.testing.assert_allclose(np.asarray(out), np.asarray(ref), rtol=1e-6, atol=1e-6)

    # Case 2: d_model multiple of 128 but small batch -> folded lane-dense path.
    seq2, batch2, d_model2 = 8, 2, 128
    pe_b = make_pe_table(d_model2, max_len)
    x_b = jax.random.normal(jax.random.PRNGKey(0), (seq2, batch2, d_model2), dtype=jnp.float32)
    ref_b = x_b + pe_b[:seq2]
    out_b = jax.block_until_ready(fwd(x_b, pe_b))
    np.testing.assert_allclose(np.asarray(out_b), np.asarray(ref_b), rtol=1e-6, atol=1e-6)

    # Case 3: lane-dense d_model and batch >= 8 -> 3-D resident-pe path.
    seq3, batch3, d_model3 = 16, 8, 256
    pe_c = make_pe_table(d_model3, max_len)
    x_c = jax.random.normal(jax.random.PRNGKey(0), (seq3, batch3, d_model3), dtype=jnp.float32)
    ref_c = x_c + pe_c[:seq3]
    out_c = jax.block_until_ready(fwd(x_c, pe_c))
    np.testing.assert_allclose(np.asarray(out_c), np.asarray(ref_c), rtol=1e-6, atol=1e-6)

    print("KERNEL_OK")
</pallas_src>

<mosaic_0001>
module attributes {stable_mosaic.version = 11 : i64} {
  func.func @_add_kernel(%arg0: i32, %arg1: i32, %arg2: memref<8x64xf32, #tpu.memory_space<vmem>>, %arg3: memref<8x64xf32, #tpu.memory_space<vmem>>, %arg4: memref<8x64xf32, #tpu.memory_space<vmem>>) attributes {dimension_semantics = [#tpu.dimension_semantics<parallel>, #tpu.dimension_semantics<parallel>], iteration_bounds = array<i64: 1, 1>, scalar_prefetch = 0 : i64, scratch_operands = 0 : i64, tpu.core_type = #tpu.core_type<tc>, window_params = [{transform_indices = @transform_0, window_bounds = array<i64: 8, 64>}, {transform_indices = @transform_1, window_bounds = array<i64: 8, 64>}, {transform_indices = @transform_2, window_bounds = array<i64: 8, 64>}]} {
    %c0 = arith.constant 0 : index
    %c0_0 = arith.constant 0 : index
    %0 = vector.load %arg2[%c0, %c0_0] : memref<8x64xf32, #tpu.memory_space<vmem>>, vector<8x64xf32>
    %c0_1 = arith.constant 0 : index
    %c0_2 = arith.constant 0 : index
    %1 = vector.load %arg3[%c0_1, %c0_2] : memref<8x64xf32, #tpu.memory_space<vmem>>, vector<8x64xf32>
    %2 = arith.addf %0, %1 : vector<8x64xf32>
    %c0_3 = arith.constant 0 : index
    %c0_4 = arith.constant 0 : index
    %3 = vector.load %arg4[%c0_3, %c0_4] : memref<8x64xf32, #tpu.memory_space<vmem>>, vector<8x64xf32>
    tpu.vector_store %arg4[%c0_3, %c0_4], %2 {strides = array<i32>} : memref<8x64xf32, #tpu.memory_space<vmem>>, vector<8x64xf32>,
    return
  }
  func.func @transform_0(%arg0: i32, %arg1: i32) -> (i32, i32) {
    %c0_i32 = arith.constant 0 : i32
    return %arg0, %arg1 : i32, i32
  }
  func.func @transform_1(%arg0: i32, %arg1: i32) -> (i32, i32) {
    %c0_i32 = arith.constant 0 : i32
    return %arg0, %arg1 : i32, i32
  }
  func.func @transform_2(%arg0: i32, %arg1: i32) -> (i32, i32) {
    %c0_i32 = arith.constant 0 : i32
    return %arg0, %arg1 : i32, i32
  }
}

</mosaic_0001>

<bundles_post_ra>
// kernel: tile.7
= control target key start
LH: loop header
LB: loop body
LE: loop exit
PB: predicated region body
PF: predicated region fallthrough
CT: control target
= control target key end

     0   :  { %vm36_vm0 = vcmask 1047556   ;;  %vm38_vm1 = vcmask 261120   ;;  %vm48_vm2 = vcmask 523520   ;;  %s99_s0 = inlined_call_operand.vmem [shape: f32[8,2,32], index: 0, kind: input, shape index: {}]   ;;  %s100_s1 = inlined_call_operand.vmem [shape: f32[8,64], index: 1, kind: output, shape index: {}]  }
   0x1   :  { %v50_v0 = vld [vmem:[%s99_s0 + $0xe] sm:$0x3]  ;;  %v51_v1 = vld [vmem:[%s99_s0 + $0xc] sm:$0x3]  ;;  %v52_v2 = vld [vmem:[%s99_s0 + $0xa] sm:$0x3] }
   0x2   :  { %7 = vst [vmem:[#allocation0 + $0x38] sm:$0x3] %v50_v0  ;;  %v53_v3 = vld [vmem:[%s99_s0 + $0x8] sm:$0x3]  ;;  %v54_v4 = vld [vmem:[%s99_s0 + $0x6] sm:$0x3] }
   0x3   :  { %11 = vst [vmem:[#allocation0 + $0x30] sm:$0x3] %v51_v1  ;;  %v55_v5 = vld [vmem:[%s99_s0 + $0x4] sm:$0x3]  ;;  %v56_v6 = vld [vmem:[%s99_s0 + $0x2] sm:$0x3] }
   0x4   :  { %15 = vst [vmem:[#allocation0 + $0x28] sm:$0x3] %v52_v2  ;;  %v32_v7 = vld [vmem:[%s99_s0] sm:$0x3]  ;;  %s58_s0 = smov 32  }
   0x5   :  { %19 = vst [vmem:[#allocation0 + $0x20] sm:$0x3] %v53_v3 }
   0x6   :  { %23 = vst [vmem:[#allocation0 + $0x18] sm:$0x3] %v54_v4 }
   0x7   :  { %27 = vst [vmem:[#allocation0 + $0x10] sm:$0x3] %v55_v5 }
   0x8   :  { %31 = vst [vmem:[#allocation0 + $0x8] sm:$0x3] %v56_v6 }
   0x9   :  { %33 = vst [vmem:[#allocation0] sm:$0x3] %v32_v7 }
   0xc   :  { %v35_v8 = vld [vmem:[#allocation0] ss:$8 sm:$0xf0]   ;;  %v43_v9 = vld [vmem:[#allocation0 + $0x1] ss:$8 sm:$0xf0]  }
  0x10   :  { %v34_v10 = vld [vmem:[#allocation0] ss:$8 sm:$0xf]   ;;  %v41_v11 = vld [vmem:[#allocation0 + $0x1] ss:$8 sm:$0xf]  }
  0x11   :  { %v37_v12 = vsel %vm36_vm0, %v35_v8, %v34_v10  ;;  %v45_v13 = vsel %vm36_vm0, %v43_v9, %v41_v11 }
  0x12   :  { %46 = vrot.lane.b32.xlu0 %v45_v13, %s58_s0  ;;  %39 = vst.msk [vmem:[%s100_s1] sm:$0xff] %vm38_vm1, %v37_v12  }
  0x84   :  { %v47_v14 = vpop.permute.xlu0 %46  }
  0x85   :  { %49 = vst.msk [vmem:[%s100_s1] sm:$0xff] %vm48_vm2, %v47_v14  }

// kernel: positional_encoding.1
= control target key start
LH: loop header
LB: loop body
LE: loop exit
PB: predicated region body
PF: predicated region fallthrough
CT: control target
= control target key end

     0   :  { %vm14_vm0 = vcmask 523264   ;;  %s44_s0 = inlined_call_operand.vmem [shape: f32[8,64], index: 0, kind: input, shape index: {}, may-alias: {0,2}]   ;;  %s45_s1 = inlined_call_operand.vmem [shape: f32[8,64], index: 1, kind: input, shape index: {}]   ;;  %s46_s2 = inlined_call_operand.vmem [shape: f32[8,64], index: 2, kind: output, shape index: {}, may-alias: {0,2}]  }
   0x1   :  { %v11_v0 = vld [vmem:[%s44_s0] sm:$0xff] }
   0x2   :  { %v12_v1 = vld [vmem:[%s45_s1] sm:$0xff] }
   0x3   :  { %v13_v2 = vadd.f32 %v12_v1, %v11_v0 }
   0x5   :  { %15 = vst.msk [vmem:[%s46_s2] sm:$0xff] %vm14_vm0, %v13_v2 }

</bundles_post_ra>
